<compile_context>
chip_gen: v7x
topology: tpu7x:2x2x1
jax: 0.10.0
libtpu: 0.0.40
codegen_flags: <defaults>
</compile_context>

<pallas_src>
import numpy as np
import jax
import jax.numpy as jnp
from jax.experimental import pallas as pl
from jax.experimental.pallas import tpu as pltpu


# ----------------------------- reference helpers (glue) ----------------------

def subscale_order(st, sh, sw):
    idx2abc = []
    abc2idx = {}
    for a in range(st):
        for b in range(sh):
            for c in range(sw):
                idx2abc.append((a, b, c))
                abc2idx[(a, b, c)] = len(idx2abc) - 1
    return idx2abc, abc2idx


def kernel_ss_mask(a, b, c, st, sh, sw, kt, kh, kw, idx2abc=None, abc2idx=None):
    """Numpy port of the PyTorch mask builder (pure python loops, tiny)."""
    if idx2abc is None or abc2idx is None:
        idx2abc, abc2idx = subscale_order(st, sh, sw)
    center = np.ones((st, sh, sw), dtype=np.float32)
    idx = abc2idx[(a, b, c)]
    for ai, bi, ci in idx2abc[idx:]:
        center[ai, bi, ci] = 0.0
    kmask = np.ones((1, 1, kt, kh, kw), dtype=np.float32)
    ct, ch, cw = kt // 2, kh // 2, kw // 2
    for kti in range(kt):
        for khi in range(kh):
            for kwi in range(kw):
                ot, oh, ow = kti - ct, khi - ch, kwi - cw
                ai, bi, ci = a + ot, b + oh, c + ow
                aii = ai % st if ai >= 0 else -(abs(ai) % st)
                bii = bi % sh if bi >= 0 else -(abs(bi) % sh)
                cii = ci % sw if ci >= 0 else -(abs(ci) % sw)
                kmask[0, 0, kti, khi, kwi] = center[aii, bii, cii]
    return kmask


def ss_shift(x, a, b, c, st, sh, sw, T, H, W, kt, kh, kw, pad_value=0.0):
    """Crop + pad so the first conv window is centered on subscale slot (a,b,c)."""
    t, h, w = T // st, H // sh, W // sw
    tl, tr = a, a + (t - 1) * st
    front, back = kt // 2 - tl, kt // 2 - (T - tr - 1)
    o_front, o_back = -min(0, front), -min(0, back)
    p_front, p_back = max(0, front), max(0, back)
    hl, hr = b, b + (h - 1) * sh
    top, bottom = kh // 2 - hl, kh // 2 - (H - hr - 1)
    o_top, o_bottom = -min(0, top), -min(0, bottom)
    p_top, p_bottom = max(0, top), max(0, bottom)
    wl, wr = c, c + (w - 1) * sw
    left, right = kw // 2 - wl, kw // 2 - (W - wr - 1)
    o_left, o_right = -min(0, left), -min(0, right)
    p_left, p_right = max(0, left), max(0, right)
    x = x[:, :, o_front:T - o_back, o_top:H - o_bottom, o_left:W - o_right]
    pad = ((0, 0), (0, 0), (p_front, p_back), (p_top, p_bottom), (p_left, p_right))
    return jnp.pad(x, pad, mode='constant', constant_values=pad_value)


# ----------------------------- Pallas kernel ----------------------------------

def _round_up(x, m):
    return (x + m - 1) // m * m


def _cdiv(a, b):
    return (a + b - 1) // b


def _matmul_bias_T_kernel(w_ref, a_ref, b_ref, o_ref, acc_ref):
    """One (m, k) grid step of outT = WmT @ AT + bias (K-tiled, f32 acc)."""
    k = pl.program_id(1)

    @pl.when(k == 0)
    def _init():
        acc_ref[...] = jnp.zeros_like(acc_ref)

    acc_ref[...] += jnp.dot(w_ref[...], a_ref[...],
                            preferred_element_type=jnp.float32)

    @pl.when(k == pl.num_programs(1) - 1)
    def _finalize():
        o_ref[...] = (acc_ref[...] + b_ref[...]).astype(o_ref.dtype)


def _matmul_bias_T(wT, aT, bias, *, tm=512, tk=512):
    """outT (N, M) = wT (N, K) @ aT (K, M) + bias, lane-dense in M.

    M (= B*t*h*w, large) sits on the 128-lane axis of both the MXU operand and
    the output; N (= C_out, small) sits on sublanes. K is tiled on a trailing
    "arbitrary" grid axis and accumulated in a float32 VMEM scratch.
    """
    N, K = wT.shape
    K2, M = aT.shape
    assert K2 == K

    TM = min(tm, _round_up(M, 128))
    # v7x shards "parallel" grid axes over 2 TensorCores: keep >=2 M blocks
    # when M allows instead of collapsing to a single grid iteration.
    if _cdiv(M, TM) < 2 and M > 128:
        TM = _round_up(_cdiv(M, 2), 128)
    TK = min(tk, _round_up(K, 128))
    K_pad = _round_up(K, TK)
    N_pad = _round_up(N, 8)

    # Pad only the K/N edges (zero-filled K padding contributes 0 to the dot).
    # M needs no padding: cdiv grid + Pallas masking of the ragged last block.
    wT_p = jnp.pad(wT, ((0, N_pad - N), (0, K_pad - K)))
    aT_p = jnp.pad(aT, ((0, K_pad - K), (0, 0)))
    b_p = jnp.pad(bias, (0, N_pad - N)).reshape(N_pad, 1)

    grid_m = _cdiv(M, TM)
    grid_k = K_pad // TK

    flops = 2 * M * K_pad * N_pad
    bytes_accessed = 4 * (wT_p.size * grid_m + aT_p.size + N_pad * M + b_p.size)

    out = pl.pallas_call(
        _matmul_bias_T_kernel,
        out_shape=jax.ShapeDtypeStruct((N_pad, M), aT.dtype),
        grid=(grid_m, grid_k),
        in_specs=[
            pl.BlockSpec((N_pad, TK), lambda m, k: (0, k)),   # WmT tile
            pl.BlockSpec((TK, TM), lambda m, k: (k, m)),      # AT tile
            pl.BlockSpec((N_pad, 1), lambda m, k: (0, 0)),    # bias
        ],
        out_specs=pl.BlockSpec((N_pad, TM), lambda m, k: (0, m)),
        scratch_shapes=[pltpu.VMEM((N_pad, TM), jnp.float32)],
        compiler_params=pltpu.CompilerParams(
            dimension_semantics=("parallel", "arbitrary"),
            vmem_limit_bytes=32 * 1024 * 1024),
        cost_estimate=pl.CostEstimate(
            flops=flops, transcendentals=0, bytes_accessed=bytes_accessed),
    )(wT_p, aT_p, b_p)
    return out[:N, :]


# ----------------------------- module ------------------------------------------

class SSConv3d:
    def __init__(self, in_channels, out_channels, kernel_size, stride,
                 bias=True, key=None):
        assert len(kernel_size) == 3 and len(stride) == 3
        self.in_channels = in_channels
        self.out_channels = out_channels
        self.kernel_size = tuple(kernel_size)
        self.stride = tuple(stride)
        if key is None:
            key = jax.random.PRNGKey(0)
        k_w, k_b = jax.random.split(key)
        fan_in = in_channels * kernel_size[0] * kernel_size[1] * kernel_size[2]
        scale = 1.0 / np.sqrt(fan_in)
        # deterministic synthetic init (the torch module leaves params uninitialized)
        self.weight = jax.random.uniform(
            k_w, (out_channels, in_channels, *kernel_size),
            minval=-scale, maxval=scale, dtype=jnp.float32)
        if bias:
            self.bias = jax.random.uniform(
                k_b, (out_channels,), minval=-scale, maxval=scale,
                dtype=jnp.float32)
        else:
            self.bias = jnp.zeros((out_channels,), jnp.float32)
        self.idx2abc, self.abc2idx = subscale_order(*stride)

    def __call__(self, x, slc):
        a, b, c = slc
        st, sh, sw = self.stride
        kt, kh, kw = self.kernel_size
        B, C, T, H, W = x.shape
        t, h, w = T // st, H // sh, W // sw

        kmask = jnp.asarray(kernel_ss_mask(a, b, c, st, sh, sw, kt, kh, kw,
                                           self.idx2abc, self.abc2idx))
        w_masked = self.weight * kmask                       # (Cout, Cin, kt, kh, kw)
        # K ordering is (k3 = (dt,dh,dw), cin) to match the AT rows below.
        WmT = jnp.transpose(w_masked, (0, 2, 3, 4, 1)).reshape(
            self.out_channels, C * kt * kh * kw)             # (Cout, K)

        xs = ss_shift(x, a, b, c, st, sh, sw, T, H, W, kt, kh, kw)
        xt = jnp.transpose(xs, (1, 0, 2, 3, 4))              # (Cin, B, Ts, Hs, Ws)

        # Transposed im2col: build AT = (K, M) directly with M = B*t*h*w on the
        # lane axis; one strided slice per kernel offset, stacked on a leading
        # dim so the final reshape needs no transpose of the patch tensor.
        # TODO(synk): move this gather into the kernel (see header note).
        patches = []
        for dt in range(kt):
            for dh in range(kh):
                for dw in range(kw):
                    patches.append(
                        xt[:, :, dt:dt + t * st:st,
                                  dh:dh + h * sh:sh,
                                  dw:dw + w * sw:sw])        # (Cin, B, t, h, w)
        AT = jnp.stack(patches, axis=0)                      # (K3, Cin, B, t, h, w)
        AT = AT.reshape(kt * kh * kw * C, B * t * h * w)     # (K, M)

        outT = _matmul_bias_T(WmT, AT, self.bias)            # (Cout, M) — Pallas
        out = outT.reshape(self.out_channels, B, t, h, w)
        return jnp.transpose(out, (1, 0, 2, 3, 4))           # (B, Cout, t, h, w)

    def reference(self, x, slc):
        """Pure-JAX reference (XLA conv) for correctness checking."""
        a, b, c = slc
        st, sh, sw = self.stride
        kt, kh, kw = self.kernel_size
        B, C, T, H, W = x.shape
        kmask = jnp.asarray(kernel_ss_mask(a, b, c, st, sh, sw, kt, kh, kw,
                                           self.idx2abc, self.abc2idx))
        xs = ss_shift(x, a, b, c, st, sh, sw, T, H, W, kt, kh, kw)
        out = jax.lax.conv_general_dilated(
            xs, self.weight * kmask, window_strides=(st, sh, sw),
            padding='VALID', dimension_numbers=('NCDHW', 'OIDHW', 'NCDHW'))
        return out + self.bias.reshape(1, -1, 1, 1, 1)


# ----------------------------- main ---------------------------------------------

if __name__ == "__main__":
    key = jax.random.PRNGKey(0)
    k_x, k_p = jax.random.split(key)

    B, Cin, Cout = 2, 4, 8
    T = H = W = 8
    kernel_size = (3, 3, 3)
    stride = (2, 2, 2)
    slc = (1, 0, 1)   # subscale slice (a, b, c)

    x = jax.random.normal(k_x, (B, Cin, T, H, W), dtype=jnp.float32)
    mod = SSConv3d(Cin, Cout, kernel_size, stride, bias=True, key=k_p)

    out = mod(x, slc)
    out = jax.block_until_ready(out)

    ref = jax.block_until_ready(mod.reference(x, slc))
    np.testing.assert_allclose(np.asarray(out), np.asarray(ref),
                               rtol=1e-5, atol=1e-5)
    assert out.shape == (B, Cout, T // stride[0], H // stride[1], W // stride[2])
    print("KERNEL_OK")
</pallas_src>

<mosaic_0001>
module attributes {stable_mosaic.version = 11 : i64} {
  func.func @_matmul_bias_T_kernel(%arg0: i32, %arg1: i32, %arg2: memref<8x128xf32, #tpu.memory_space<vmem>>, %arg3: memref<128x128xf32, #tpu.memory_space<vmem>>, %arg4: memref<8x1xf32, #tpu.memory_space<vmem>>, %arg5: memref<8x128xf32, #tpu.memory_space<vmem>>, %arg6: memref<8x128xf32, #tpu.memory_space<vmem>>) attributes {dimension_semantics = [#tpu.dimension_semantics<parallel>, #tpu.dimension_semantics<arbitrary>], iteration_bounds = array<i64: 1, 1>, scalar_prefetch = 0 : i64, scratch_operands = 1 : i64, tpu.core_type = #tpu.core_type<tc>, window_params = [{transform_indices = @transform_0, window_bounds = array<i64: 8, 128>}, {transform_indices = @transform_1, window_bounds = array<i64: 128, 128>}, {pipeline_mode = #tpu.pipeline_mode<synchronous>, transform_indices = @transform_2, window_bounds = array<i64: 8, 1>}, {transform_indices = @transform_3, window_bounds = array<i64: 8, 128>}]} {
    %c0_i32 = arith.constant 0 : i32
    %0 = arith.cmpi eq, %arg1, %c0_i32 : i32
    %1 = arith.extui %0 : i1 to i32
    %c0_i32_0 = arith.constant 0 : i32
    %2 = arith.cmpi ne, %1, %c0_i32_0 : i32
    scf.if %2 {
      %cst_10 = arith.constant 0.000000e+00 : f32
      %12 = vector.broadcast %cst_10 : f32 to vector<8x128xf32>
      %c0_11 = arith.constant 0 : index
      %c0_12 = arith.constant 0 : index
      %13 = vector.load %arg6[%c0_11, %c0_12] : memref<8x128xf32, #tpu.memory_space<vmem>>, vector<8x128xf32>
      tpu.vector_store %arg6[%c0_11, %c0_12], %12 {strides = array<i32>} : memref<8x128xf32, #tpu.memory_space<vmem>>, vector<8x128xf32>,
    } else {
    }
    %c0 = arith.constant 0 : index
    %c0_1 = arith.constant 0 : index
    %3 = vector.load %arg6[%c0, %c0_1] : memref<8x128xf32, #tpu.memory_space<vmem>>, vector<8x128xf32>
    %c0_2 = arith.constant 0 : index
    %c0_3 = arith.constant 0 : index
    %4 = vector.load %arg2[%c0_2, %c0_3] : memref<8x128xf32, #tpu.memory_space<vmem>>, vector<8x128xf32>
    %c0_4 = arith.constant 0 : index
    %c0_5 = arith.constant 0 : index
    %5 = vector.load %arg3[%c0_4, %c0_5] : memref<128x128xf32, #tpu.memory_space<vmem>>, vector<128x128xf32>
    %cst = arith.constant dense<0.000000e+00> : vector<8x128xf32>
    %6 = tpu.matmul %4, %5, %cst {dimension_numbers = #tpu.dot_dimension_numbers<[1], [0], [0], [1], [0, 0, 1, 1], [], []>} : vector<8x128xf32>, vector<128x128xf32>, vector<8x128xf32> -> vector<8x128xf32>
    %7 = arith.addf %3, %6 : vector<8x128xf32>
    %c0_6 = arith.constant 0 : index
    %c0_7 = arith.constant 0 : index
    %8 = vector.load %arg6[%c0_6, %c0_7] : memref<8x128xf32, #tpu.memory_space<vmem>>, vector<8x128xf32>
    tpu.vector_store %arg6[%c0_6, %c0_7], %7 {strides = array<i32>} : memref<8x128xf32, #tpu.memory_space<vmem>>, vector<8x128xf32>,
    %c0_i32_8 = arith.constant 0 : i32
    %9 = arith.cmpi eq, %arg1, %c0_i32_8 : i32
    %10 = arith.extui %9 : i1 to i32
    %c0_i32_9 = arith.constant 0 : i32
    %11 = arith.cmpi ne, %10, %c0_i32_9 : i32
    scf.if %11 {
      %c0_10 = arith.constant 0 : index
      %c0_11 = arith.constant 0 : index
      %12 = vector.load %arg6[%c0_10, %c0_11] : memref<8x128xf32, #tpu.memory_space<vmem>>, vector<8x128xf32>
      %c0_12 = arith.constant 0 : index
      %c0_13 = arith.constant 0 : index
      %13 = vector.load %arg4[%c0_12, %c0_13] : memref<8x1xf32, #tpu.memory_space<vmem>>, vector<8x1xf32>
      %14 = vector.broadcast %13 : vector<8x1xf32> to vector<8x128xf32>
      %15 = arith.addf %12, %14 : vector<8x128xf32>
      %c0_14 = arith.constant 0 : index
      %c0_15 = arith.constant 0 : index
      %16 = vector.load %arg5[%c0_14, %c0_15] : memref<8x128xf32, #tpu.memory_space<vmem>>, vector<8x128xf32>
      tpu.vector_store %arg5[%c0_14, %c0_15], %15 {strides = array<i32>} : memref<8x128xf32, #tpu.memory_space<vmem>>, vector<8x128xf32>,
    } else {
    }
    return
  }
  func.func @transform_0(%arg0: i32, %arg1: i32) -> (i32, i32) {
    %c0_i32 = arith.constant 0 : i32
    %c0_i32_0 = arith.constant 0 : i32
    return %c0_i32, %arg1 : i32, i32
  }
  func.func @transform_1(%arg0: i32, %arg1: i32) -> (i32, i32) {
    %c0_i32 = arith.constant 0 : i32
    return %arg1, %arg0 : i32, i32
  }
  func.func @transform_2(%arg0: i32, %arg1: i32) -> (i32, i32) {
    %c0_i32 = arith.constant 0 : i32
    %c0_i32_0 = arith.constant 0 : i32
    %c0_i32_1 = arith.constant 0 : i32
    return %c0_i32, %c0_i32_0 : i32, i32
  }
  func.func @transform_3(%arg0: i32, %arg1: i32) -> (i32, i32) {
    %c0_i32 = arith.constant 0 : i32
    %c0_i32_0 = arith.constant 0 : i32
    return %c0_i32, %arg0 : i32, i32
  }
}

</mosaic_0001>

<bundles_post_ra>
// kernel: tpu_custom_call.1
= control target key start
LH: loop header
LB: loop body
LE: loop exit
PB: predicated region body
PF: predicated region fallthrough
CT: control target
= control target key end

     0   :  { %8 = vsyncpa [#allocation4], 0  ;;  %s342_s0 = inlined_call_operand.vmem [shape: f32[8,128], index: 0, kind: input, shape index: {}]   ;;  %s343_s1 = inlined_call_operand.hbm [shape: f32[128,128], index: 1, kind: input, shape index: {}]   ;;  %s344_s2 = inlined_call_operand.vmem [shape: f32[8,1], index: 2, kind: input, shape index: {}]   ;;  %s345_s3 = inlined_call_operand.hbm [shape: f32[8,128], index: 3, kind: output, shape index: {}]  }
   0x1   :  { %9 = vsyncpa [#allocation5], 0  ;;  %s284_s12 = smov [#allocation3]   ;;  %s236_s16 = scalar_lea.hbm %s343_s1, 2048 }
   0x2   :  { %s17_s13 = sshll.u32 %s284_s12, 4  ;;  %p237_p0 = scmp.ne.s32.totalorder %s343_s1, %s236_s16  ;;  %s18_s13 = int_to_ptr.vmem [resolvable:$true] %s17_s13 }
   0x3   :  { %p240_p1 = scmp.lt.u32.totalorder %s236_s16, %s343_s1 }
   0x5   :  { %p242_p2 = pnand %p240_p1, %p237_p0 }
   0x7   :  { %245 = shalt.err (!%p242_p2)
}
   0x8   :  { %s246_s21 = scalar_lea.vmem %s18_s13, 2048  ;;  %p251_p4 = scmp.lt.s32.totalorder %s18_s13, %s18_s13 }
   0x9   :  { %p247_p3 = scmp.ne.s32.totalorder %s18_s13, %s246_s21  ;;  %p252_p5 = scmp.lt.s32.totalorder %s246_s21, %s246_s21 }
   0xb   :  { %p253_p6 = por %p252_p5, %p251_p4 }
   0xd   :  { %p254_p7 = pnand %p253_p6, %p247_p3 }
   0xf   :  { %257 = shalt.err (!%p254_p7)
}
  0x10   :  { %s285_s22 = smov 128   ;;  %s286_s23 = smov 8  }
  0x11   :  { %23 = dma.hbm_to_vmem [thread:$0]  %s343_s1, 2048, %s18_s13, [#allocation4], %s285_s22, %s285_s22, %s286_s23  }
  0x12   :  { %280 = dma.done.wait [#allocation4], 2048  }
  0x13   :  { %281 = vsyncadd [#allocation4], 4294965248  ;;  %v287_v0 = vmov 0.0|0.0   ;;  %vm288_vm0 = vmmov 0   ;;  %v289_v1 = vmov 0.0   ;;  %v290_v2 = vmov 0  }
  0x14   :  { %203 = vmatprep.subr.bf16.mxu0 %v287_v0  ;;  %200 = vmatprep.mubr.msk.f32.mxu0 %vm288_vm0, %v289_v1  ;;  %v36_v3 = vld [vmem:[#allocation3] sm:$0xff]  ;;  %v37_v4 = vld [vmem:[#allocation3 + $0x8] sm:$0xff]  ;;  %v38_v5 = vld [vmem:[#allocation3 + $0x10] sm:$0xff]  ;;  %s291_s28 = smov [#allocation6]  }
  0x15   :  { %235 = vset.pattern.permute.xlu0 %v290_v2  ;;  %v204_v6 = vpack.c.bf16 %v37_v4, %v36_v3  ;;  %v39_v7 = vld [vmem:[#allocation3 + $0x18] sm:$0xff]  ;;  %v40_v9 = vld [vmem:[#allocation3 + $0x20] sm:$0xff]  ;;  %v41_v10 = vld [vmem:[#allocation3 + $0x28] sm:$0xff]  ;;  %s142_s29 = sshll.u32 %s291_s28, 4  ;;  %s143_s29 = int_to_ptr.vmem [resolvable:$true] %s142_s29 }
  0x16   :  { %v207_v8 = vpack.c.bf16 %v39_v7, %v38_v5  ;;  %v128_v11 = vld [vmem:[%s344_s2] sm:$0xff]  ;;  %v210_v12 = vpack.c.bf16 %v41_v10, %v40_v9  ;;  %v42_v13 = vld [vmem:[#allocation3 + $0x30] sm:$0xff]  ;;  %v43_v14 = vld [vmem:[#allocation3 + $0x38] sm:$0xff]  ;;  %s258_s30 = scalar_lea.vmem %s143_s29, 128  ;;  %p263_p9 = scmp.lt.s32.totalorder %s143_s29, %s143_s29 }
  0x17   :  { %205 = vmatpush3.bf16.msra.mxu0 %v204_v6  ;;  %131 = vperm.xlu0 %235, %v128_v11   ;;  %v213_v15 = vpack.c.bf16 %v43_v14, %v42_v13  ;;  %v44_v16 = vld [vmem:[#allocation3 + $0x40] sm:$0xff]  ;;  %v45_v17 = vld [vmem:[#allocation3 + $0x48] sm:$0xff]  ;;  %v46_v19 = vld [vmem:[#allocation3 + $0x50] sm:$0xff]  ;;  %p259_p8 = scmp.ne.s32.totalorder %s143_s29, %s258_s30  ;;  %p264_p10 = scmp.lt.s32.totalorder %s258_s30, %s258_s30 }
  0x18   :  { %206 = vmatprep.subr.bf16.mxu0 %v287_v0  ;;  %v216_v18 = vpack.c.bf16 %v45_v17, %v44_v16  ;;  %v47_v20 = vld [vmem:[#allocation3 + $0x58] sm:$0xff]  ;;  %v48_v22 = vld [vmem:[#allocation3 + $0x60] sm:$0xff]  ;;  %v49_v23 = vld [vmem:[#allocation3 + $0x68] sm:$0xff] }
  0x19   :  { %v219_v21 = vpack.c.bf16 %v47_v20, %v46_v19  ;;  %v222_v24 = vpack.c.bf16 %v49_v23, %v48_v22  ;;  %v50_v25 = vld [vmem:[#allocation3 + $0x70] sm:$0xff]  ;;  %v51_v26 = vld [vmem:[#allocation3 + $0x78] sm:$0xff]  ;;  %v35_v28 = vld [vmem:[%s342_s0] sm:$0xff]  ;;  %p265_p11 = por %p264_p10, %p263_p9 }
  0x1a   :  { %v225_v27 = vpack.c.bf16 %v51_v26, %v50_v25 }
  0x1b   :  { %208 = vmatpush3.bf16.msra.mxu0 %v207_v8  ;;  %p266_p12 = pnand %p265_p11, %p259_p8 }
  0x1c   :  { %209 = vmatprep.subr.bf16.mxu0 %v287_v0 }
  0x1f   :  { %211 = vmatpush3.bf16.msra.mxu0 %v210_v12 }
  0x20   :  { %212 = vmatprep.subr.bf16.mxu0 %v287_v0 }
  0x23   :  { %214 = vmatpush3.bf16.msra.mxu0 %v213_v15 }
  0x24   :  { %215 = vmatprep.subr.bf16.mxu0 %v287_v0 }
  0x27   :  { %217 = vmatpush3.bf16.msra.mxu0 %v216_v18 }
  0x28   :  { %218 = vmatprep.subr.bf16.mxu0 %v287_v0 }
  0x2b   :  { %220 = vmatpush3.bf16.msra.mxu0 %v219_v21 }
  0x2c   :  { %221 = vmatprep.subr.bf16.mxu0 %v287_v0 }
  0x2f   :  { %223 = vmatpush3.bf16.msra.mxu0 %v222_v24 }
  0x30   :  { %224 = vmatprep.subr.bf16.mxu0 %v287_v0 }
  0x33   :  { %226 = vmatpush3.bf16.msra.mxu0 %v225_v27 }
  0x36   :  { %201 = vmatmul.mubr.f32.vlgmr.msra.gmra.mrb[0].mxu0 %v35_v28 }
  0x96   :  { %v132_v29 = vpop.permute.xlu0 %131 }
 0x109   :  { %v118_v30 = vpop.f32.mrb[0].mxu0 }
 0x10a   :  { %v134_v31 = vadd.f32 %v132_v29, %v118_v30  ;;  %v202_v32 = vpop.f32.mrb[1].mxu0 }
 0x10c   :  { %135 = vst [vmem:[#allocation6] sm:$0xff] %v134_v31 }
 0x10d   :  { %269 = shalt.err (!%p266_p12)
}
 0x10e   :  { %s270_s0 = scalar_lea.hbm %s345_s3, 128 }
 0x10f   :  { %p271_p13 = scmp.ne.s32.totalorder %s345_s3, %s270_s0  ;;  %p274_p0 = scmp.lt.u32.totalorder %s270_s0, %s345_s3 }
 0x111   :  { %p276_p1 = pnand %p274_p0, %p271_p13 }
 0x113   :  { %279 = shalt.err (!%p276_p1)
}
 0x114   :  { %145 = dma.vmem_to_hbm [thread:$0]  %s143_s29, 128, %s345_s3, [#allocation5]  }
 0x115   :  { %282 = dma.done.wait [#allocation5], 128  }
 0x116   :  { %283 = vsyncadd [#allocation5], 4294967168 }
 0x117   :  { %149 = vsyncpa [#allocation4], 1 }
 0x118   :  { %150 = vsyncpa [#allocation5], 1 }

</bundles_post_ra>
